<compile_context>
chip_gen: v7x
topology: tpu7x:2x2x1
jax: 0.10.0
libtpu: 0.0.40
codegen_flags: <defaults>
</compile_context>

<pallas_src>
import functools

import jax
import jax.numpy as jnp
from jax.experimental import pallas as pl
from jax.experimental.pallas import tpu as pltpu


def _round_up(x, m):
    return ((x + m - 1) // m) * m


def _default_tiles():
    """Generation-tuned (block_m, block_n, block_k)."""
    kind = jax.devices()[0].device_kind.lower()
    if "v6" in kind:        # v6e / Trillium: 32 MiB scoped default, 128 MiB physical
        return 1024, 1024, 1024
    if "7" in kind:         # v7x: 64 MiB physical per TC, 2 TCs share HBM
        return 512, 1024, 2048
    # v5e / unknown: stays inside the 16 MiB scoped-VMEM default
    return 512, 512, 1024


def _linear_kernel(x_ref, w_ref, b_ref, o_ref):
    # x_ref: (tm, tk) input block (bf16 or f32)
    # w_ref: (tk, tn) weight block, already transposed to (in, out) layout
    # b_ref: (1, tn)  f32 bias slice
    # o_ref: (tm, tn) f32 output block, resident across the K axis -> accumulator
    k = pl.program_id(2)

    @pl.when(k == 0)
    def _():
        o_ref[...] = jnp.zeros_like(o_ref)

    wv = w_ref[...]
    xv = x_ref[...].astype(wv.dtype)  # no-op if x was pre-cast in the wrapper
    o_ref[...] += jnp.dot(xv, wv, preferred_element_type=jnp.float32)

    @pl.when(k == pl.num_programs(2) - 1)
    def _():
        o_ref[...] += b_ref[...]


def prepare_params(weight, bias, *, use_bf16=True):
    """One-time parameter prep (amortized across calls).

    weight: (N, K) float32, PyTorch nn.Linear layout.
    Returns weight transposed to (K, N) in the compute dtype + f32 bias, so the
    per-call path performs no HBM transpose/cast of the parameters.
    """
    dt = jnp.bfloat16 if use_bf16 else jnp.float32
    w_t = jnp.asarray(weight).T.astype(dt)          # (K, N)
    b = jnp.asarray(bias).astype(jnp.float32)       # (N,)
    return w_t, b


@functools.partial(
    jax.jit,
    static_argnames=("block_m", "block_n", "block_k", "weight_resident_bytes"),
)
def softmax_layer_forward(
    x,
    weight_t,
    bias,
    *,
    block_m=None,
    block_n=None,
    block_k=None,
    weight_resident_bytes=4 * 1024 * 1024,
):
    """out = x @ W^T + b, with W pre-transposed to weight_t = W.T of shape (K, N)."""
    lead = x.shape[:-1]
    K = x.shape[-1]
    K2, N = weight_t.shape
    assert K == K2, "weight_t must be (input_size, output_size)"
    x2 = x.reshape(-1, K)
    M = x2.shape[0]
    cdt = weight_t.dtype

    bm, bn, bk = _default_tiles()
    if block_m is not None:
        bm = block_m
    if block_n is not None:
        bn = block_n
    if block_k is not None:
        bk = block_k

    # Tile sizes clamped to the (alignment-padded) extents; always multiples of
    # (8, 128) on the sublane/lane dims.
    tm = min(bm, _round_up(M, 8))
    tn = min(bn, _round_up(N, 128))
    tk = min(bk, _round_up(K, 128))

    # Weight-resident variant: whole (K, N) weight small enough to sit in VMEM ->
    # single weight block with a constant index, DMA'd once and reused per M tile.
    k_full = _round_up(K, 128)
    n_full = _round_up(N, 128)
    if k_full * n_full * cdt.itemsize <= weight_resident_bytes:
        tk = k_full
        tn = n_full
        tm = min(tm, 512)  # keep the f32 output tile footprint bounded

    # Explicit zero-padding to tile multiples (padded K contributes 0 to the dot).
    Mp = _round_up(M, tm)
    Np = _round_up(N, tn)
    Kp = _round_up(K, tk)

    if (Mp, Kp) != (M, K):
        x2 = jnp.pad(x2, ((0, Mp - M), (0, Kp - K)))
    if (Kp, Np) != (K, N):
        weight_t = jnp.pad(weight_t, ((0, Kp - K), (0, Np - N)))
    b2 = bias.astype(jnp.float32).reshape(1, N)
    if Np != N:
        b2 = jnp.pad(b2, ((0, 0), (0, Np - N)))

    # x wrapper cast only pays off when x is re-streamed over >= ~3 N tiles;
    # otherwise keep it f32 and cast per-tile inside the kernel.
    n_tiles_j = Np // tn
    if cdt == jnp.bfloat16 and x2.dtype != jnp.bfloat16 and n_tiles_j >= 3:
        x2 = x2.astype(jnp.bfloat16)

    grid = (Mp // tm, Np // tn, Kp // tk)

    # Footprint-derived scoped-VMEM limit (double-buffered inputs + resident out).
    xb = x2.dtype.itemsize
    wb = cdt.itemsize
    footprint = 2 * (tm * tk * xb + tk * tn * wb + tm * tn * 4) + 2 * tn * 4
    vmem_limit = min(int(footprint * 1.5) + (8 << 20), 64 << 20)

    cost = pl.CostEstimate(
        flops=2 * Mp * Np * Kp,
        transcendentals=0,
        bytes_accessed=Mp * Kp * xb + Kp * Np * wb + Mp * Np * 4 + Np * 4,
    )

    out = pl.pallas_call(
        _linear_kernel,
        out_shape=jax.ShapeDtypeStruct((Mp, Np), jnp.float32),
        grid_spec=pltpu.PrefetchScalarGridSpec(
            num_scalar_prefetch=0,
            grid=grid,
            in_specs=[
                pl.BlockSpec((tm, tk), lambda i, j, k: (i, k)),  # x
                pl.BlockSpec((tk, tn), lambda i, j, k: (k, j)),  # weight (K, N)
                pl.BlockSpec((1, tn), lambda i, j, k: (0, j)),   # bias
            ],
            out_specs=pl.BlockSpec((tm, tn), lambda i, j, k: (i, j)),
        ),
        compiler_params=pltpu.CompilerParams(
            dimension_semantics=("parallel", "parallel", "arbitrary"),
            vmem_limit_bytes=vmem_limit,
        ),
        cost_estimate=cost,
    )(x2, weight_t, b2)

    if (Mp, Np) != (M, N):
        out = out[:M, :N]
    return out.reshape(*lead, N)


def init_softmax_layer_params(key, input_size, output_size):
    """Matches the PyTorch module init: weight ~ Normal(0, 0.01), bias = 0."""
    w = 0.01 * jax.random.normal(key, (output_size, input_size), dtype=jnp.float32)
    b = jnp.zeros((output_size,), dtype=jnp.float32)
    return w, b


if __name__ == "__main__":
    key = jax.random.PRNGKey(0)
    k_w, k_x, k_w2, k_x2 = jax.random.split(key, 4)

    # --- tiny demo shapes from the module (classifier head) -------------------
    batch, input_size, output_size = 8, 32, 16
    weight, bias = init_softmax_layer_params(k_w, input_size, output_size)
    w_t, b_p = prepare_params(weight, bias, use_bf16=True)
    x = jax.random.normal(k_x, (batch, input_size), dtype=jnp.float32)

    out = softmax_layer_forward(x, w_t, b_p)
    jax.block_until_ready(out)
    ref = x @ weight.T + bias
    assert out.shape == (batch, output_size) and out.dtype == jnp.float32
    assert jnp.allclose(out, ref, atol=5e-3, rtol=5e-2), float(
        jnp.max(jnp.abs(out - ref))
    )

    # --- ragged (non-tile-multiple) shapes: exercises the padding path --------
    M2, K2, N2 = 70, 200, 100
    weight2, bias2 = init_softmax_layer_params(k_w2, K2, N2)
    w2_t, b2_p = prepare_params(weight2, bias2, use_bf16=True)
    x2 = jax.random.normal(k_x2, (M2, K2), dtype=jnp.float32)

    out2 = softmax_layer_forward(x2, w2_t, b2_p)
    jax.block_until_ready(out2)
    ref2 = x2 @ weight2.T + bias2
    assert out2.shape == (M2, N2)
    assert jnp.allclose(out2, ref2, atol=5e-3, rtol=5e-2), float(
        jnp.max(jnp.abs(out2 - ref2))
    )

    print("KERNEL_OK")
</pallas_src>

<mosaic_0001>
module attributes {stable_mosaic.version = 11 : i64} {
  func.func @_linear_kernel(%arg0: i32, %arg1: i32, %arg2: i32, %arg3: memref<8x128xf32, #tpu.memory_space<vmem>>, %arg4: memref<128x128xbf16, #tpu.memory_space<vmem>>, %arg5: memref<1x128xf32, #tpu.memory_space<vmem>>, %arg6: memref<8x128xf32, #tpu.memory_space<vmem>>) attributes {dimension_semantics = [#tpu.dimension_semantics<parallel>, #tpu.dimension_semantics<parallel>, #tpu.dimension_semantics<arbitrary>], iteration_bounds = array<i64: 1, 1, 1>, scalar_prefetch = 0 : i64, scratch_operands = 0 : i64, tpu.core_type = #tpu.core_type<tc>, window_params = [{transform_indices = @transform_0, window_bounds = array<i64: 8, 128>}, {transform_indices = @transform_1, window_bounds = array<i64: 128, 128>}, {transform_indices = @transform_2, window_bounds = array<i64: 1, 128>}, {transform_indices = @transform_3, window_bounds = array<i64: 8, 128>}]} {
    %c0_i32 = arith.constant 0 : i32
    %0 = arith.cmpi eq, %arg2, %c0_i32 : i32
    %1 = arith.extui %0 : i1 to i32
    %c0_i32_0 = arith.constant 0 : i32
    %2 = arith.cmpi ne, %1, %c0_i32_0 : i32
    scf.if %2 {
      %cst_10 = arith.constant 0.000000e+00 : f32
      %13 = vector.broadcast %cst_10 : f32 to vector<8x128xf32>
      %c0_11 = arith.constant 0 : index
      %c0_12 = arith.constant 0 : index
      %14 = vector.load %arg6[%c0_11, %c0_12] : memref<8x128xf32, #tpu.memory_space<vmem>>, vector<8x128xf32>
      tpu.vector_store %arg6[%c0_11, %c0_12], %13 {strides = array<i32>} : memref<8x128xf32, #tpu.memory_space<vmem>>, vector<8x128xf32>,
    } else {
    }
    %c0 = arith.constant 0 : index
    %c0_1 = arith.constant 0 : index
    %3 = vector.load %arg4[%c0, %c0_1] : memref<128x128xbf16, #tpu.memory_space<vmem>>, vector<128x128xbf16>
    %c0_2 = arith.constant 0 : index
    %c0_3 = arith.constant 0 : index
    %4 = vector.load %arg3[%c0_2, %c0_3] : memref<8x128xf32, #tpu.memory_space<vmem>>, vector<8x128xf32>
    %5 = arith.truncf %4 : vector<8x128xf32> to vector<8x128xbf16>
    %c0_4 = arith.constant 0 : index
    %c0_5 = arith.constant 0 : index
    %6 = vector.load %arg6[%c0_4, %c0_5] : memref<8x128xf32, #tpu.memory_space<vmem>>, vector<8x128xf32>
    %cst = arith.constant dense<0.000000e+00> : vector<8x128xf32>
    %7 = tpu.matmul %5, %3, %cst {dimension_numbers = #tpu.dot_dimension_numbers<[1], [0], [0], [1], [0, 0, 1, 1], [], []>} : vector<8x128xbf16>, vector<128x128xbf16>, vector<8x128xf32> -> vector<8x128xf32>
    %8 = arith.addf %6, %7 : vector<8x128xf32>
    %c0_6 = arith.constant 0 : index
    %c0_7 = arith.constant 0 : index
    %9 = vector.load %arg6[%c0_6, %c0_7] : memref<8x128xf32, #tpu.memory_space<vmem>>, vector<8x128xf32>
    tpu.vector_store %arg6[%c0_6, %c0_7], %8 {strides = array<i32>} : memref<8x128xf32, #tpu.memory_space<vmem>>, vector<8x128xf32>,
    %c0_i32_8 = arith.constant 0 : i32
    %10 = arith.cmpi eq, %arg2, %c0_i32_8 : i32
    %11 = arith.extui %10 : i1 to i32
    %c0_i32_9 = arith.constant 0 : i32
    %12 = arith.cmpi ne, %11, %c0_i32_9 : i32
    scf.if %12 {
      %c0_10 = arith.constant 0 : index
      %c0_11 = arith.constant 0 : index
      %13 = vector.load %arg6[%c0_10, %c0_11] : memref<8x128xf32, #tpu.memory_space<vmem>>, vector<8x128xf32>
      %c0_12 = arith.constant 0 : index
      %c0_13 = arith.constant 0 : index
      %14 = vector.load %arg5[%c0_12, %c0_13] : memref<1x128xf32, #tpu.memory_space<vmem>>, vector<1x128xf32>
      %15 = vector.broadcast %14 : vector<1x128xf32> to vector<8x128xf32>
      %16 = arith.addf %13, %15 : vector<8x128xf32>
      %c0_14 = arith.constant 0 : index
      %c0_15 = arith.constant 0 : index
      %17 = vector.load %arg6[%c0_14, %c0_15] : memref<8x128xf32, #tpu.memory_space<vmem>>, vector<8x128xf32>
      tpu.vector_store %arg6[%c0_14, %c0_15], %16 {strides = array<i32>} : memref<8x128xf32, #tpu.memory_space<vmem>>, vector<8x128xf32>,
    } else {
    }
    return
  }
  func.func @transform_0(%arg0: i32, %arg1: i32, %arg2: i32) -> (i32, i32) {
    %c0_i32 = arith.constant 0 : i32
    return %arg0, %arg2 : i32, i32
  }
  func.func @transform_1(%arg0: i32, %arg1: i32, %arg2: i32) -> (i32, i32) {
    %c0_i32 = arith.constant 0 : i32
    return %arg2, %arg1 : i32, i32
  }
  func.func @transform_2(%arg0: i32, %arg1: i32, %arg2: i32) -> (i32, i32) {
    %c0_i32 = arith.constant 0 : i32
    %c0_i32_0 = arith.constant 0 : i32
    return %c0_i32, %arg1 : i32, i32
  }
  func.func @transform_3(%arg0: i32, %arg1: i32, %arg2: i32) -> (i32, i32) {
    %c0_i32 = arith.constant 0 : i32
    return %arg0, %arg1 : i32, i32
  }
}

</mosaic_0001>

<bundles_post_ra>
// kernel: softmax_layer_forward.1
= control target key start
LH: loop header
LB: loop body
LE: loop exit
PB: predicated region body
PF: predicated region fallthrough
CT: control target
= control target key end

     0   :  { %v230_v1 = vmov 0.0   ;;  %vm231_vm0 = vmmov 0   ;;  %s295_s0 = inlined_call_operand.vmem [shape: f32[8,128], index: 0, kind: input, shape index: {}]   ;;  %s296_s1 = inlined_call_operand.vmem [shape: bf16[128,128], index: 1, kind: input, shape index: {}]   ;;  %s297_s2 = inlined_call_operand.vmem [shape: f32[1,128], index: 2, kind: input, shape index: {}]   ;;  %s298_s3 = inlined_call_operand.hbm [shape: f32[8,128], index: 3, kind: output, shape index: {}]  }
   0x1   :  { %v198_v0 = vld [vmem:[%s296_s1] sm:$0xff]   ;;  %175 = vmatprep.subr.bf16.mxu0 %v230_v1  ;;  %v199_v2 = vld [vmem:[%s296_s1 + $0x8] sm:$0xff]   ;;  %191 = vmatprep.mubr.msk.bf16.mxu0 %vm231_vm0, %v230_v1  ;;  %v200_v3 = vld [vmem:[%s296_s1 + $0x10] sm:$0xff]  }
   0x2   :  { %176 = vmatpush3.bf16.msra.mxu0 %v198_v0 }
   0x3   :  { %177 = vmatprep.subr.bf16.mxu0 %v230_v1 }
   0x6   :  { %178 = vmatpush3.bf16.msra.mxu0 %v199_v2 }
   0x7   :  { %179 = vmatprep.subr.bf16.mxu0 %v230_v1 }
   0x8   :  { %8 = vsyncpa [#allocation3], 0  ;;  %v201_v4 = vld [vmem:[%s296_s1 + $0x18] sm:$0xff]   ;;  %v202_v5 = vld [vmem:[%s296_s1 + $0x20] sm:$0xff]   ;;  %s232_s5 = smov [#allocation2]  }
   0x9   :  { %v203_v6 = vld [vmem:[%s296_s1 + $0x28] sm:$0xff]   ;;  %v204_v7 = vld [vmem:[%s296_s1 + $0x30] sm:$0xff]   ;;  %v205_v8 = vld [vmem:[%s296_s1 + $0x38] sm:$0xff]   ;;  %s149_s6 = sshll.u32 %s232_s5, 4  ;;  %s150_s6 = int_to_ptr.vmem [resolvable:$true] %s149_s6 }
   0xa   :  { %180 = vmatpush3.bf16.msra.mxu0 %v200_v3  ;;  %v37_v9 = vld [vmem:[%s295_s0] sm:$0xff]  ;;  %s206_s1 = scalar_lea.vmem %s150_s6, 128  ;;  %p211_p1 = scmp.lt.s32.totalorder %s150_s6, %s150_s6 }
   0xb   :  { %181 = vmatprep.subr.bf16.mxu0 %v230_v1  ;;  %v38_v10 = vpack.c.bf16 %v37_v9, %v37_v9  ;;  %v165_v12 = vld [vmem:[%s297_s2] ss:$0 sm:$0xff]  ;;  %p207_p0 = scmp.ne.s32.totalorder %s150_s6, %s206_s1  ;;  %p212_p2 = scmp.lt.s32.totalorder %s206_s1, %s206_s1 }
   0xd   :  { %p213_p3 = por %p212_p2, %p211_p1 }
   0xe   :  { %182 = vmatpush3.bf16.msra.mxu0 %v201_v4 }
   0xf   :  { %183 = vmatprep.subr.bf16.mxu0 %v230_v1  ;;  %p214_p4 = pnand %p213_p3, %p207_p0 }
  0x12   :  { %184 = vmatpush3.bf16.msra.mxu0 %v202_v5 }
  0x13   :  { %185 = vmatprep.subr.bf16.mxu0 %v230_v1 }
  0x16   :  { %186 = vmatpush3.bf16.msra.mxu0 %v203_v6 }
  0x17   :  { %187 = vmatprep.subr.bf16.mxu0 %v230_v1 }
  0x1a   :  { %188 = vmatpush3.bf16.msra.mxu0 %v204_v7 }
  0x1b   :  { %189 = vmatprep.subr.bf16.mxu0 %v230_v1 }
  0x1e   :  { %190 = vmatpush3.bf16.msra.mxu0 %v205_v8 }
  0x21   :  { %192 = vmatmul.mubr.bf16.vlgmr.msra.gmra.mrb[0].mxu0 %v38_v10 }
  0xf4   :  { %v122_v11 = vpop.f32.mrb[0].mxu0 }
  0xf5   :  { %v193_v13 = vpop.f32.mrb[1].mxu0  ;;  %v141_v16 = vadd.f32 %v165_v12, %v122_v11 }
  0xf6   :  { %v125_v14 = vpop.f32.mrb[2].mxu0 }
  0xf7   :  { %v194_v15 = vpop.f32.mrb[3].mxu0  ;;  %142 = vst [vmem:[#allocation2] sm:$0xff] %v141_v16 }
  0xf8   :  { %217 = shalt.err (!%p214_p4)
}
  0xf9   :  { %s218_s8 = scalar_lea.hbm %s298_s3, 128 }
  0xfa   :  { %p219_p5 = scmp.ne.s32.totalorder %s298_s3, %s218_s8  ;;  %p222_p6 = scmp.lt.u32.totalorder %s218_s8, %s298_s3 }
  0xfc   :  { %p224_p7 = pnand %p222_p6, %p219_p5 }
  0xfe   :  { %227 = shalt.err (!%p224_p7)
}
  0xff   :  { %152 = dma.vmem_to_hbm [thread:$0]  %s150_s6, 128, %s298_s3, [#allocation3]  }
 0x100   :  { %228 = dma.done.wait [#allocation3], 128  }
 0x101   :  { %229 = vsyncadd [#allocation3], 4294967168 }
 0x102   :  { %156 = vsyncpa [#allocation3], 1 }

</bundles_post_ra>
